<compile_context>
chip_gen: v5e
topology: v5e:2x2
jax: 0.10.0
libtpu: 0.0.40
codegen_flags: <defaults>
</compile_context>

<pallas_src>
import jax
import jax.numpy as jnp
from jax.experimental import pallas as pl
from jax.experimental.pallas import tpu as pltpu

IN_FEATURES = 16   # stand-in for train_features.shape[1] (data-dependent in the original)
HIDDEN = 128
OUT = 3


def _round_up(n, m):
    return ((n + m - 1) // m) * m


def mlp_kernel(x_ref, w1_ref, b1_ref, w4_ref, b4_ref, o_ref):
    # x arrives f32 straight from HBM; cast the VMEM tile to bf16 for the MXU.
    x = x_ref[...].astype(w1_ref.dtype)
    # fc1: (TB, F) @ (F, H) on the MXU, f32 accumulation.
    h = jnp.dot(x, w1_ref[...], preferred_element_type=jnp.float32)
    # bias + ReLU epilogue in f32 (v5e has no bf16 VPU).
    h = jnp.maximum(h + b1_ref[...], 0.0)
    # dropout1 (p=0.5) in eval mode is the identity.
    # fc4: (TB, H) @ (H, O) on the MXU, f32 accumulation; output stored unpadded (O=3).
    out = jnp.dot(h.astype(w4_ref.dtype), w4_ref[...],
                  preferred_element_type=jnp.float32) + b4_ref[...]
    o_ref[...] = out.astype(o_ref.dtype)


def mlp_forward(x, w1, b1, w4, b4, *, block_b=8192, compute_dtype=jnp.bfloat16):
    """x: [B, F] f32.  w1: [F, H], b1: [H] or [1, H], w4: [H, O], b4: [O] or [1, O].
    Weights are stored [in, out] (transpose of PyTorch's [out, in])."""
    B, F = x.shape
    H = w1.shape[1]
    O = w4.shape[1]

    # Batch tile: multiple of 8 (sublane rule) or the full batch dim.
    # Aim for >=2 roughly-even blocks (v7x has 2 TCs sharded over "parallel" axes).
    if B <= 8:
        TB = B
    else:
        TB = min(block_b, _round_up(pl.cdiv(B, 2), 8))
    num_blocks = pl.cdiv(B, TB)

    # Weights/biases are tiny; cast once (bf16 for MXU inputs, f32 biases for epilogue).
    w1c = w1.astype(compute_dtype)
    b1c = jnp.reshape(b1, (1, H)).astype(jnp.float32)
    w4c = w4.astype(compute_dtype)
    b4c = jnp.reshape(b4, (1, O)).astype(jnp.float32)

    cost = pl.CostEstimate(
        flops=2 * B * (F * H + H * O),
        transcendentals=0,
        bytes_accessed=B * F * 4 + B * O * 4 + (F * H + H * O) * 2 + (H + O) * 4,
    )

    return pl.pallas_call(
        mlp_kernel,
        out_shape=jax.ShapeDtypeStruct((B, O), jnp.float32),
        grid=(num_blocks,),
        in_specs=[
            pl.BlockSpec((TB, F), lambda i: (i, 0)),   # x: streamed per batch tile, unpadded
            pl.BlockSpec((F, H), lambda i: (0, 0)),    # w1: VMEM-resident
            pl.BlockSpec((1, H), lambda i: (0, 0)),    # b1: VMEM-resident
            pl.BlockSpec((H, O), lambda i: (0, 0)),    # w4: VMEM-resident
            pl.BlockSpec((1, O), lambda i: (0, 0)),    # b4: VMEM-resident
        ],
        out_specs=pl.BlockSpec((TB, O), lambda i: (i, 0)),
        compiler_params=pltpu.CompilerParams(
            dimension_semantics=("parallel",)),        # batch tiles independent (v7x: 2 TCs)
        cost_estimate=cost,
    )(x, w1c, b1c, w4c, b4c)


def init_params(key, in_features=IN_FEATURES, hidden=HIDDEN, out=OUT):
    """Deterministic init mimicking PyTorch nn.Linear (uniform ±1/sqrt(fan_in)).
    Weights stored as [in, out] (transpose of PyTorch's [out, in])."""
    k1, k2, k3, k4 = jax.random.split(key, 4)
    bound1 = 1.0 / jnp.sqrt(in_features)
    bound4 = 1.0 / jnp.sqrt(hidden)
    w1 = jax.random.uniform(k1, (in_features, hidden), jnp.float32, -bound1, bound1)
    b1 = jax.random.uniform(k2, (1, hidden), jnp.float32, -bound1, bound1)
    w4 = jax.random.uniform(k3, (hidden, out), jnp.float32, -bound4, bound4)
    b4 = jax.random.uniform(k4, (1, out), jnp.float32, -bound4, bound4)
    return w1, b1, w4, b4


def _reference(x, w1, b1, w4, b4):
    # Plain-JAX reference mirroring the kernel's bf16-in / f32-acc math.
    xb = x.astype(jnp.bfloat16).astype(jnp.float32)
    w1b = w1.astype(jnp.bfloat16).astype(jnp.float32)
    w4b = w4.astype(jnp.bfloat16).astype(jnp.float32)
    h = jnp.maximum(xb @ w1b + b1, 0.0)
    return h.astype(jnp.bfloat16).astype(jnp.float32) @ w4b + b4


if __name__ == "__main__":
    key = jax.random.PRNGKey(0)
    kx, kx2, kp = jax.random.split(key, 3)
    w1, b1, w4, b4 = init_params(kp)

    # Small single-block case.
    B = 8
    x = jax.random.normal(kx, (B, IN_FEATURES), dtype=jnp.float32)
    out = mlp_forward(x, w1, b1, w4, b4)
    jax.block_until_ready(out)
    assert out.shape == (B, OUT)
    ref = _reference(x, w1, b1, w4, b4)
    assert jnp.allclose(out, ref, atol=1e-4, rtol=1e-4), (
        float(jnp.max(jnp.abs(out - ref))))

    # Multi-block case exercising the ragged last batch tile (B=20 -> TB=16, 2 blocks).
    B2 = 20
    x2 = jax.random.normal(kx2, (B2, IN_FEATURES), dtype=jnp.float32)
    out2 = mlp_forward(x2, w1, b1, w4, b4)
    jax.block_until_ready(out2)
    assert out2.shape == (B2, OUT)
    ref2 = _reference(x2, w1, b1, w4, b4)
    assert jnp.allclose(out2, ref2, atol=1e-4, rtol=1e-4), (
        float(jnp.max(jnp.abs(out2 - ref2))))

    print("KERNEL_OK")
</pallas_src>

<mosaic_0001>
module attributes {stable_mosaic.version = 11 : i64} {
  func.func @mlp_kernel(%arg0: i32, %arg1: memref<8x16xf32, #tpu.memory_space<vmem>>, %arg2: memref<16x128xbf16, #tpu.memory_space<vmem>>, %arg3: memref<1x128xf32, #tpu.memory_space<vmem>>, %arg4: memref<128x3xbf16, #tpu.memory_space<vmem>>, %arg5: memref<1x3xf32, #tpu.memory_space<vmem>>, %arg6: memref<8x3xf32, #tpu.memory_space<vmem>>) attributes {dimension_semantics = [#tpu.dimension_semantics<parallel>], iteration_bounds = array<i64: 1>, scalar_prefetch = 0 : i64, scratch_operands = 0 : i64, tpu.core_type = #tpu.core_type<tc>, window_params = [{transform_indices = @transform_0, window_bounds = array<i64: 8, 16>}, {pipeline_mode = #tpu.pipeline_mode<synchronous>, transform_indices = @transform_1, window_bounds = array<i64: 16, 128>}, {pipeline_mode = #tpu.pipeline_mode<synchronous>, transform_indices = @transform_2, window_bounds = array<i64: 1, 128>}, {pipeline_mode = #tpu.pipeline_mode<synchronous>, transform_indices = @transform_3, window_bounds = array<i64: 128, 3>}, {pipeline_mode = #tpu.pipeline_mode<synchronous>, transform_indices = @transform_4, window_bounds = array<i64: 1, 3>}, {transform_indices = @transform_5, window_bounds = array<i64: 8, 3>}]} {
    %c0 = arith.constant 0 : index
    %c0_0 = arith.constant 0 : index
    %0 = vector.load %arg1[%c0, %c0_0] : memref<8x16xf32, #tpu.memory_space<vmem>>, vector<8x16xf32>
    %1 = arith.truncf %0 : vector<8x16xf32> to vector<8x16xbf16>
    %c0_1 = arith.constant 0 : index
    %c0_2 = arith.constant 0 : index
    %2 = vector.load %arg2[%c0_1, %c0_2] : memref<16x128xbf16, #tpu.memory_space<vmem>>, vector<16x128xbf16>
    %cst = arith.constant dense<0.000000e+00> : vector<8x128xf32>
    %3 = tpu.matmul %1, %2, %cst {dimension_numbers = #tpu.dot_dimension_numbers<[1], [0], [0], [1], [0, 0, 1, 1], [], []>} : vector<8x16xbf16>, vector<16x128xbf16>, vector<8x128xf32> -> vector<8x128xf32>
    %c0_3 = arith.constant 0 : index
    %c0_4 = arith.constant 0 : index
    %4 = vector.load %arg3[%c0_3, %c0_4] : memref<1x128xf32, #tpu.memory_space<vmem>>, vector<1x128xf32>
    %5 = vector.broadcast %4 : vector<1x128xf32> to vector<8x128xf32>
    %6 = arith.addf %3, %5 : vector<8x128xf32>
    %cst_5 = arith.constant 0.000000e+00 : f32
    %7 = vector.broadcast %cst_5 : f32 to vector<8x128xf32>
    %8 = arith.maximumf %6, %7 : vector<8x128xf32>
    %9 = arith.truncf %8 : vector<8x128xf32> to vector<8x128xbf16>
    %c0_6 = arith.constant 0 : index
    %c0_7 = arith.constant 0 : index
    %10 = vector.load %arg4[%c0_6, %c0_7] : memref<128x3xbf16, #tpu.memory_space<vmem>>, vector<128x3xbf16>
    %cst_8 = arith.constant dense<0.000000e+00> : vector<8x3xf32>
    %11 = tpu.matmul %9, %10, %cst_8 {dimension_numbers = #tpu.dot_dimension_numbers<[1], [0], [0], [1], [0, 0, 1, 1], [], []>} : vector<8x128xbf16>, vector<128x3xbf16>, vector<8x3xf32> -> vector<8x3xf32>
    %c0_9 = arith.constant 0 : index
    %c0_10 = arith.constant 0 : index
    %12 = vector.load %arg5[%c0_9, %c0_10] : memref<1x3xf32, #tpu.memory_space<vmem>>, vector<1x3xf32>
    %13 = vector.broadcast %12 : vector<1x3xf32> to vector<8x3xf32>
    %14 = arith.addf %11, %13 : vector<8x3xf32>
    %c0_11 = arith.constant 0 : index
    %c0_12 = arith.constant 0 : index
    %15 = vector.load %arg6[%c0_11, %c0_12] : memref<8x3xf32, #tpu.memory_space<vmem>>, vector<8x3xf32>
    tpu.vector_store %arg6[%c0_11, %c0_12], %14 {strides = array<i32>} : memref<8x3xf32, #tpu.memory_space<vmem>>, vector<8x3xf32>,
    return
  }
  func.func @transform_0(%arg0: i32) -> (i32, i32) {
    %c0_i32 = arith.constant 0 : i32
    %c0_i32_0 = arith.constant 0 : i32
    return %arg0, %c0_i32 : i32, i32
  }
  func.func @transform_1(%arg0: i32) -> (i32, i32) {
    %c0_i32 = arith.constant 0 : i32
    %c0_i32_0 = arith.constant 0 : i32
    %c0_i32_1 = arith.constant 0 : i32
    return %c0_i32, %c0_i32_0 : i32, i32
  }
  func.func @transform_2(%arg0: i32) -> (i32, i32) {
    %c0_i32 = arith.constant 0 : i32
    %c0_i32_0 = arith.constant 0 : i32
    %c0_i32_1 = arith.constant 0 : i32
    return %c0_i32, %c0_i32_0 : i32, i32
  }
  func.func @transform_3(%arg0: i32) -> (i32, i32) {
    %c0_i32 = arith.constant 0 : i32
    %c0_i32_0 = arith.constant 0 : i32
    %c0_i32_1 = arith.constant 0 : i32
    return %c0_i32, %c0_i32_0 : i32, i32
  }
  func.func @transform_4(%arg0: i32) -> (i32, i32) {
    %c0_i32 = arith.constant 0 : i32
    %c0_i32_0 = arith.constant 0 : i32
    %c0_i32_1 = arith.constant 0 : i32
    return %c0_i32, %c0_i32_0 : i32, i32
  }
  func.func @transform_5(%arg0: i32) -> (i32, i32) {
    %c0_i32 = arith.constant 0 : i32
    %c0_i32_0 = arith.constant 0 : i32
    return %arg0, %c0_i32 : i32, i32
  }
}

</mosaic_0001>

<bundles_post_ra>
// kernel: tpu_custom_call.1
= control target key start
LH: loop header
LB: loop body
LE: loop exit
PB: predicated region body
PF: predicated region fallthrough
CT: control target
= control target key end

     0   :  { %vm35_vm0 = vcmask 130048   ;;  %vm135_vm1 = vcmask 23552   ;;  %s258_s1 = inlined_call_operand.vmem [shape: bf16[16,128], index: 1, kind: input, shape index: {}]   ;;  %s259_s0 = inlined_call_operand.vmem [shape: f32[8,16], index: 0, kind: input, shape index: {}]   ;;  %s260_s3 = inlined_call_operand.vmem [shape: bf16[128,3], index: 3, kind: input, shape index: {}]   ;;  %s261_s2 = inlined_call_operand.vmem [shape: f32[1,128], index: 2, kind: input, shape index: {}]   ;;  %s262_s4 = inlined_call_operand.vmem [shape: f32[1,3], index: 4, kind: input, shape index: {}]   ;;  %s263_s5 = inlined_call_operand.vmem [shape: f32[8,3], index: 5, kind: output, shape index: {}]  }
   0x1   :  { %v178_v0 = vld [vmem:[%s258_s1] sm:$0xff]  ;;  %v186_v2 = vld [vmem:[%s260_s3 + $0x38] sm:$0xff]  ;;  %v185_v4 = vld [vmem:[%s260_s3 + $0x30] sm:$0xff] }
   0x2   :  { %v21_v1 = vld [vmem:[%s259_s0] sm:$0xff]  ;;  %46 = vmatpush.bf16.msra.mxu0 %v178_v0  ;;  %122 = vmatpush.bf16.msra.mxu1 %v186_v2  ;;  %v184_v5 = vld [vmem:[%s260_s3 + $0x28] sm:$0xff]  ;;  %v182_v7 = vld [vmem:[%s260_s3 + $0x18] sm:$0xff] }
   0x3   :  { %v22_v3 = vpack.c.bf16 %v21_v1, %v21_v1  ;;  %v183_v6 = vld [vmem:[%s260_s3 + $0x20] sm:$0xff]  ;;  %v181_v8 = vld [vmem:[%s260_s3 + $0x10] sm:$0xff]  ;;  %v180_v9 = vld [vmem:[%s260_s3 + $0x8] sm:$0xff] }
   0x4   :  { %v179_v10 = vld [vmem:[%s260_s3] sm:$0xff] }
   0x5   :  { %145 = vmatmul.msk.bf16.vlgmr.msra.gmra.mxu0 %vm35_vm0, %v22_v3  ;;  %v187_v11 = vld [vmem:[%s261_s2] ss:$0 sm:$0xff] }
   0x6   :  { %123 = vmatpush.bf16.msra.mxu1 %v185_v4  ;;  %v188_v17 = vld [vmem:[%s262_s4] ss:$0 sm:$0xff] }
   0xa   :  { %124 = vmatpush.bf16.msra.mxu1 %v184_v5 }
   0xe   :  { %125 = vmatpush.bf16.msra.mxu1 %v183_v6 }
  0x12   :  { %126 = vmatpush.bf16.msra.mxu1 %v182_v7 }
  0x16   :  { %127 = vmatpush.bf16.msra.mxu1 %v181_v8 }
  0x1a   :  { %128 = vmatpush.bf16.msra.mxu1 %v180_v9 }
  0x1e   :  { %129 = vmatpush.bf16.msra.mxu1 %v179_v10 }
  0x82   :  { %v48_v12 = vpop.f32.mrf.mxu0 }
  0x83   :  { %v49_v13 = vadd.f32 %v187_v11, %v48_v12 }
  0x85   :  { %v52_v14 = vmax.f32 %v49_v13, 0.0 }
  0x87   :  { %v53_v15 = vpack.c.bf16 %v52_v14, %v52_v14 }
  0x89   :  { %130 = vmatmul.bf16.vlgmr.msra.gmra.mxu1 %v53_v15 }
  0x8a   :  { %v50_v16 = vpop.f32.mrf.mxu0 }
 0x106   :  { %v131_v18 = vpop.f32.mrf.mxu1 }
 0x107   :  { %v132_v19 = vadd.f32 %v188_v17, %v131_v18 }
 0x109   :  { %136 = vst.msk [vmem:[%s263_s5] sm:$0xff] %vm135_vm1, %v132_v19 }
 0x10e   :  { %v133_v20 = vpop.f32.mrf.mxu1 }

</bundles_post_ra>
